<compile_context>
chip_gen: v7x
topology: tpu7x:2x2x1
jax: 0.10.0
libtpu: 0.0.40
codegen_flags: <defaults>
</compile_context>

<pallas_src>
import jax
import jax.numpy as jnp
from jax.experimental import pallas as pl
from jax.experimental.pallas import tpu as pltpu


def _round_up(n, m):
    return ((n + m - 1) // m) * m


def _mlp_kernel(x_ref, w1_ref, b1_ref, w2_ref, b2_ref, w3_ref, o_ref):
    # fc1 + bias + ReLU  (MXU matmul with f32 accumulation; bias/ReLU in f32)
    z1 = jnp.dot(x_ref[...], w1_ref[...], preferred_element_type=jnp.float32)
    x1 = jnp.maximum(z1 + b1_ref[...], 0.0)
    # fc2 + bias + ReLU
    z2 = jnp.dot(x1.astype(w2_ref.dtype), w2_ref[...],
                 preferred_element_type=jnp.float32)
    x2 = jnp.maximum(z2 + b2_ref[...], 0.0)
    # fc3 (no bias)
    o_ref[...] = jnp.dot(x2.astype(w3_ref.dtype), w3_ref[...],
                         preferred_element_type=jnp.float32)


def two_layer_fc_forward(x, w1, b1, w2, b2, w3, *,
                         compute_dtype=jnp.bfloat16, tile_b=512):
    """Fused 3-layer MLP forward pass in one Pallas kernel.

    x : [B, input_dims] f32
    w1: [input_dims, h1]   (== PyTorch fc1.weight.T)
    b1: [1, h1]
    w2: [h1, h2]
    b2: [1, h2]
    w3: [h2, output_dims]  (fc3 has bias=False)
    returns: [B, output_dims] f32
    """
    B, Din = x.shape
    H1 = w1.shape[1]
    H2 = w2.shape[1]
    Dout = w3.shape[1]

    # Lane-dense padding: every matmul dim a multiple of 128.
    Din_p, H1_p, H2_p, Dout_p = (_round_up(d, 128) for d in (Din, H1, H2, Dout))

    # Batch tile: multiple of 8 sublanes, capped at `tile_b` rows.
    tb = max(8, min(_round_up(tile_b, 8), _round_up(B, 8)))
    Bp = _round_up(B, tb)
    grid = (pl.cdiv(Bp, tb),)

    cdt = jnp.dtype(compute_dtype)
    xp = jnp.zeros((Bp, Din_p), cdt).at[:B, :Din].set(x.astype(cdt))
    w1p = jnp.zeros((Din_p, H1_p), cdt).at[:Din, :H1].set(w1.astype(cdt))
    w2p = jnp.zeros((H1_p, H2_p), cdt).at[:H1, :H2].set(w2.astype(cdt))
    w3p = jnp.zeros((H2_p, Dout_p), cdt).at[:H2, :Dout].set(w3.astype(cdt))
    b1p = jnp.zeros((1, H1_p), jnp.float32).at[:, :H1].set(
        b1.reshape(1, H1).astype(jnp.float32))
    b2p = jnp.zeros((1, H2_p), jnp.float32).at[:, :H2].set(
        b2.reshape(1, H2).astype(jnp.float32))

    # VMEM budget (conservative: assume 2 buffers for every operand) -> scoped
    # limit, capped at 64 MiB so the same configuration is safe on v7x.
    witm = cdt.itemsize
    weight_bytes = (Din_p * H1_p + H1_p * H2_p + H2_p * Dout_p) * witm * 2
    bias_bytes = (H1_p + H2_p) * 4 * 2
    io_bytes = 2 * tb * (Din_p * witm + Dout_p * 4)
    inter_bytes = 2 * tb * (H1_p + H2_p) * 4
    est = weight_bytes + bias_bytes + io_bytes + inter_bytes
    vmem_limit = int(min(max(int(1.5 * est) + (4 << 20), 16 << 20), 64 << 20))

    flops = 2 * Bp * (Din_p * H1_p + H1_p * H2_p + H2_p * Dout_p)
    bytes_accessed = (xp.size * witm
                      + (w1p.size + w2p.size + w3p.size) * witm
                      + (b1p.size + b2p.size) * 4
                      + Bp * Dout_p * 4)

    out_padded = pl.pallas_call(
        _mlp_kernel,
        out_shape=jax.ShapeDtypeStruct((Bp, Dout_p), jnp.float32),
        grid=grid,
        in_specs=[
            pl.BlockSpec((tb, Din_p), lambda i: (i, 0)),     # x: tiled over batch
            pl.BlockSpec((Din_p, H1_p), lambda i: (0, 0)),   # weights/biases resident
            pl.BlockSpec((1, H1_p), lambda i: (0, 0)),
            pl.BlockSpec((H1_p, H2_p), lambda i: (0, 0)),
            pl.BlockSpec((1, H2_p), lambda i: (0, 0)),
            pl.BlockSpec((H2_p, Dout_p), lambda i: (0, 0)),
        ],
        out_specs=pl.BlockSpec((tb, Dout_p), lambda i: (i, 0)),
        compiler_params=pltpu.CompilerParams(
            dimension_semantics=("parallel",),   # megacore-shard the batch axis
            vmem_limit_bytes=vmem_limit,
        ),
        cost_estimate=pl.CostEstimate(
            flops=flops, transcendentals=0, bytes_accessed=bytes_accessed),
    )(xp, w1p, b1p, w2p, b2p, w3p)

    # TODO(synk): return_activations=True path (x1, x2) not exposed as kernel outputs.
    return out_padded[:B, :Dout]


def init_params(key, input_dims, h1_dims, h2_dims, output_dims):
    """Deterministic init mimicking nn.Linear's U(-1/sqrt(fan_in), 1/sqrt(fan_in))."""
    k1, k2, k3, k4, k5 = jax.random.split(key, 5)

    def lin(kw, fan_in, fan_out):
        bound = 1.0 / jnp.sqrt(jnp.float32(fan_in))
        # stored as [in, out]  (== PyTorch weight.T)
        return jax.random.uniform(kw, (fan_in, fan_out), jnp.float32, -bound, bound)

    w1 = lin(k1, input_dims, h1_dims)
    b1 = jax.random.uniform(k2, (1, h1_dims), jnp.float32,
                            -1.0 / jnp.sqrt(jnp.float32(input_dims)),
                            1.0 / jnp.sqrt(jnp.float32(input_dims)))
    w2 = lin(k3, h1_dims, h2_dims)
    b2 = jax.random.uniform(k4, (1, h2_dims), jnp.float32,
                            -1.0 / jnp.sqrt(jnp.float32(h1_dims)),
                            1.0 / jnp.sqrt(jnp.float32(h1_dims)))
    w3 = lin(k5, h2_dims, output_dims)  # fc3 has bias=False
    return w1, b1, w2, b2, w3


if __name__ == "__main__":
    # Small shapes consistent with the module's forward: x is [batch, input_dims].
    batch, input_dims, h1_dims, h2_dims, output_dims = 8, 32, 64, 64, 16

    key = jax.random.PRNGKey(0)
    kx, kp = jax.random.split(key)
    x = jax.random.normal(kx, (batch, input_dims), jnp.float32)
    w1, b1, w2, b2, w3 = init_params(kp, input_dims, h1_dims, h2_dims, output_dims)

    # Pure-JAX reference of the forward-pass semantics (f32).
    x1_ref = jnp.maximum(x @ w1 + b1, 0.0)
    x2_ref = jnp.maximum(x1_ref @ w2 + b2, 0.0)
    ref = x2_ref @ w3

    # f32 compute path: matches the PyTorch module semantics tightly.
    out_f32 = jax.block_until_ready(
        two_layer_fc_forward(x, w1, b1, w2, b2, w3, compute_dtype=jnp.float32))
    assert out_f32.shape == (batch, output_dims)
    assert jnp.allclose(out_f32, ref, atol=1e-4, rtol=1e-4)

    # Default bf16 matmul path (f32 accumulation + f32 bias/ReLU): loose tolerance.
    out_bf16 = jax.block_until_ready(two_layer_fc_forward(x, w1, b1, w2, b2, w3))
    assert out_bf16.shape == (batch, output_dims)
    assert jnp.allclose(out_bf16, ref, atol=3e-2, rtol=3e-2)

    print("KERNEL_OK")
</pallas_src>

<mosaic_0001>
module attributes {stable_mosaic.version = 11 : i64} {
  func.func @_mlp_kernel(%arg0: i32, %arg1: memref<8x128xf32, #tpu.memory_space<vmem>>, %arg2: memref<128x128xf32, #tpu.memory_space<vmem>>, %arg3: memref<1x128xf32, #tpu.memory_space<vmem>>, %arg4: memref<128x128xf32, #tpu.memory_space<vmem>>, %arg5: memref<1x128xf32, #tpu.memory_space<vmem>>, %arg6: memref<128x128xf32, #tpu.memory_space<vmem>>, %arg7: memref<8x128xf32, #tpu.memory_space<vmem>>) attributes {dimension_semantics = [#tpu.dimension_semantics<parallel>], iteration_bounds = array<i64: 1>, scalar_prefetch = 0 : i64, scratch_operands = 0 : i64, tpu.core_type = #tpu.core_type<tc>, window_params = [{transform_indices = @transform_0, window_bounds = array<i64: 8, 128>}, {pipeline_mode = #tpu.pipeline_mode<synchronous>, transform_indices = @transform_1, window_bounds = array<i64: 128, 128>}, {pipeline_mode = #tpu.pipeline_mode<synchronous>, transform_indices = @transform_2, window_bounds = array<i64: 1, 128>}, {pipeline_mode = #tpu.pipeline_mode<synchronous>, transform_indices = @transform_3, window_bounds = array<i64: 128, 128>}, {pipeline_mode = #tpu.pipeline_mode<synchronous>, transform_indices = @transform_4, window_bounds = array<i64: 1, 128>}, {pipeline_mode = #tpu.pipeline_mode<synchronous>, transform_indices = @transform_5, window_bounds = array<i64: 128, 128>}, {transform_indices = @transform_6, window_bounds = array<i64: 8, 128>}]} {
    %c0 = arith.constant 0 : index
    %c0_0 = arith.constant 0 : index
    %0 = vector.load %arg1[%c0, %c0_0] : memref<8x128xf32, #tpu.memory_space<vmem>>, vector<8x128xf32>
    %c0_1 = arith.constant 0 : index
    %c0_2 = arith.constant 0 : index
    %1 = vector.load %arg2[%c0_1, %c0_2] : memref<128x128xf32, #tpu.memory_space<vmem>>, vector<128x128xf32>
    %cst = arith.constant dense<0.000000e+00> : vector<8x128xf32>
    %2 = tpu.matmul %0, %1, %cst {dimension_numbers = #tpu.dot_dimension_numbers<[1], [0], [0], [1], [0, 0, 1, 1], [], []>} : vector<8x128xf32>, vector<128x128xf32>, vector<8x128xf32> -> vector<8x128xf32>
    %c0_3 = arith.constant 0 : index
    %c0_4 = arith.constant 0 : index
    %3 = vector.load %arg3[%c0_3, %c0_4] : memref<1x128xf32, #tpu.memory_space<vmem>>, vector<1x128xf32>
    %4 = vector.broadcast %3 : vector<1x128xf32> to vector<8x128xf32>
    %5 = arith.addf %2, %4 : vector<8x128xf32>
    %cst_5 = arith.constant 0.000000e+00 : f32
    %6 = vector.broadcast %cst_5 : f32 to vector<8x128xf32>
    %7 = arith.maximumf %5, %6 : vector<8x128xf32>
    %c0_6 = arith.constant 0 : index
    %c0_7 = arith.constant 0 : index
    %8 = vector.load %arg4[%c0_6, %c0_7] : memref<128x128xf32, #tpu.memory_space<vmem>>, vector<128x128xf32>
    %cst_8 = arith.constant dense<0.000000e+00> : vector<8x128xf32>
    %9 = tpu.matmul %7, %8, %cst_8 {dimension_numbers = #tpu.dot_dimension_numbers<[1], [0], [0], [1], [0, 0, 1, 1], [], []>} : vector<8x128xf32>, vector<128x128xf32>, vector<8x128xf32> -> vector<8x128xf32>
    %c0_9 = arith.constant 0 : index
    %c0_10 = arith.constant 0 : index
    %10 = vector.load %arg5[%c0_9, %c0_10] : memref<1x128xf32, #tpu.memory_space<vmem>>, vector<1x128xf32>
    %11 = vector.broadcast %10 : vector<1x128xf32> to vector<8x128xf32>
    %12 = arith.addf %9, %11 : vector<8x128xf32>
    %cst_11 = arith.constant 0.000000e+00 : f32
    %13 = vector.broadcast %cst_11 : f32 to vector<8x128xf32>
    %14 = arith.maximumf %12, %13 : vector<8x128xf32>
    %c0_12 = arith.constant 0 : index
    %c0_13 = arith.constant 0 : index
    %15 = vector.load %arg6[%c0_12, %c0_13] : memref<128x128xf32, #tpu.memory_space<vmem>>, vector<128x128xf32>
    %cst_14 = arith.constant dense<0.000000e+00> : vector<8x128xf32>
    %16 = tpu.matmul %14, %15, %cst_14 {dimension_numbers = #tpu.dot_dimension_numbers<[1], [0], [0], [1], [0, 0, 1, 1], [], []>} : vector<8x128xf32>, vector<128x128xf32>, vector<8x128xf32> -> vector<8x128xf32>
    %c0_15 = arith.constant 0 : index
    %c0_16 = arith.constant 0 : index
    %17 = vector.load %arg7[%c0_15, %c0_16] : memref<8x128xf32, #tpu.memory_space<vmem>>, vector<8x128xf32>
    tpu.vector_store %arg7[%c0_15, %c0_16], %16 {strides = array<i32>} : memref<8x128xf32, #tpu.memory_space<vmem>>, vector<8x128xf32>,
    return
  }
  func.func @transform_0(%arg0: i32) -> (i32, i32) {
    %c0_i32 = arith.constant 0 : i32
    %c0_i32_0 = arith.constant 0 : i32
    return %arg0, %c0_i32 : i32, i32
  }
  func.func @transform_1(%arg0: i32) -> (i32, i32) {
    %c0_i32 = arith.constant 0 : i32
    %c0_i32_0 = arith.constant 0 : i32
    %c0_i32_1 = arith.constant 0 : i32
    return %c0_i32, %c0_i32_0 : i32, i32
  }
  func.func @transform_2(%arg0: i32) -> (i32, i32) {
    %c0_i32 = arith.constant 0 : i32
    %c0_i32_0 = arith.constant 0 : i32
    %c0_i32_1 = arith.constant 0 : i32
    return %c0_i32, %c0_i32_0 : i32, i32
  }
  func.func @transform_3(%arg0: i32) -> (i32, i32) {
    %c0_i32 = arith.constant 0 : i32
    %c0_i32_0 = arith.constant 0 : i32
    %c0_i32_1 = arith.constant 0 : i32
    return %c0_i32, %c0_i32_0 : i32, i32
  }
  func.func @transform_4(%arg0: i32) -> (i32, i32) {
    %c0_i32 = arith.constant 0 : i32
    %c0_i32_0 = arith.constant 0 : i32
    %c0_i32_1 = arith.constant 0 : i32
    return %c0_i32, %c0_i32_0 : i32, i32
  }
  func.func @transform_5(%arg0: i32) -> (i32, i32) {
    %c0_i32 = arith.constant 0 : i32
    %c0_i32_0 = arith.constant 0 : i32
    %c0_i32_1 = arith.constant 0 : i32
    return %c0_i32, %c0_i32_0 : i32, i32
  }
  func.func @transform_6(%arg0: i32) -> (i32, i32) {
    %c0_i32 = arith.constant 0 : i32
    %c0_i32_0 = arith.constant 0 : i32
    return %arg0, %c0_i32 : i32, i32
  }
}

</mosaic_0001>

<bundles_post_ra>
// kernel: tpu_custom_call.1
= control target key start
LH: loop header
LB: loop body
LE: loop exit
PB: predicated region body
PF: predicated region fallthrough
CT: control target
= control target key end

     0   :  { %11 = vsyncpa [#allocation3], 0  ;;  %s878_s0 = inlined_call_operand.hbm [shape: f32[8,128], index: 0, kind: input, shape index: {}]   ;;  %s879_s1 = inlined_call_operand.hbm [shape: f32[128,128], index: 1, kind: input, shape index: {}]   ;;  %s880_s2 = inlined_call_operand.vmem [shape: f32[1,128], index: 2, kind: input, shape index: {}]   ;;  %s881_s3 = inlined_call_operand.hbm [shape: f32[128,128], index: 3, kind: input, shape index: {}]   ;;  %s882_s4 = inlined_call_operand.vmem [shape: f32[1,128], index: 4, kind: input, shape index: {}]   ;;  %s883_s5 = inlined_call_operand.hbm [shape: f32[128,128], index: 5, kind: input, shape index: {}]   ;;  %s884_s6 = inlined_call_operand.hbm [shape: f32[8,128], index: 6, kind: output, shape index: {}]  }
   0x1   :  { %12 = vsyncpa [#allocation6], 0 }
   0x2   :  { %13 = vsyncpa [#allocation9], 0 }
   0x3   :  { %14 = vsyncpa [#allocation4], 0  ;;  %s728_s21 = smov [#allocation5]   ;;  %s610_s25 = scalar_lea.hbm %s879_s1, 2048 }
   0x4   :  { %s30_s22 = sshll.u32 %s728_s21, 4  ;;  %p611_p0 = scmp.ne.s32.totalorder %s879_s1, %s610_s25  ;;  %s31_s22 = int_to_ptr.vmem [resolvable:$true] %s30_s22 }
   0x5   :  { %p614_p1 = scmp.lt.u32.totalorder %s610_s25, %s879_s1 }
   0x7   :  { %p616_p2 = pnand %p614_p1, %p611_p0 }
   0x9   :  { %619 = shalt.err (!%p616_p2)
}
   0xa   :  { %s620_s30 = scalar_lea.vmem %s31_s22, 2048  ;;  %p625_p4 = scmp.lt.s32.totalorder %s31_s22, %s31_s22 }
   0xb   :  { %p621_p3 = scmp.ne.s32.totalorder %s31_s22, %s620_s30  ;;  %p626_p5 = scmp.lt.s32.totalorder %s620_s30, %s620_s30 }
   0xd   :  { %p627_p6 = por %p626_p5, %p625_p4 }
   0xf   :  { %p628_p7 = pnand %p627_p6, %p621_p3 }
  0x11   :  { %631 = shalt.err (!%p628_p7)
}
  0x12   :  { %s729_s7 = smov 128   ;;  %s730_s8 = smov 8  }
  0x13   :  { %36 = dma.hbm_to_vmem [thread:$0]  %s879_s1, 2048, %s31_s22, [#allocation6], %s729_s7, %s729_s7, %s730_s8  }
  0x14   :  { %s731_s11 = smov [#allocation2]   ;;  %s732_s13 = smov [#allocation7]  }
  0x15   :  { %s21_s12 = sshll.u32 %s731_s11, 4  ;;  %s44_s14 = sshll.u32 %s732_s13, 4  ;;  %s22_s12 = int_to_ptr.vmem [resolvable:$true] %s21_s12  ;;  %s45_s14 = int_to_ptr.vmem [resolvable:$true] %s44_s14 }
  0x16   :  { %s632_s17 = scalar_lea.hbm %s878_s0, 128 }
  0x17   :  { %p633_p8 = scmp.ne.s32.totalorder %s878_s0, %s632_s17  ;;  %p636_p9 = scmp.lt.u32.totalorder %s632_s17, %s878_s0 }
  0x19   :  { %p638_p10 = pnand %p636_p9, %p633_p8 }
  0x1b   :  { %641 = shalt.err (!%p638_p10)
}
  0x1c   :  { %s642_s1 = scalar_lea.vmem %s22_s12, 128  ;;  %p647_p12 = scmp.lt.s32.totalorder %s22_s12, %s22_s12 }
  0x1d   :  { %p643_p11 = scmp.ne.s32.totalorder %s22_s12, %s642_s1  ;;  %p648_p13 = scmp.lt.s32.totalorder %s642_s1, %s642_s1 }
  0x1f   :  { %p649_p0 = por %p648_p13, %p647_p12 }
  0x21   :  { %p650_p1 = pnand %p649_p0, %p643_p11 }
  0x23   :  { %653 = shalt.err (!%p650_p1)
}
  0x24   :  { %24 = dma.hbm_to_vmem [thread:$0]  %s878_s0, 128, %s22_s12, [#allocation3]  }
  0x25   :  { %s654_s26 = scalar_lea.hbm %s881_s3, 2048 }
  0x26   :  { %p655_p2 = scmp.ne.s32.totalorder %s881_s3, %s654_s26  ;;  %p658_p3 = scmp.lt.u32.totalorder %s654_s26, %s881_s3 }
  0x28   :  { %p660_p4 = pnand %p658_p3, %p655_p2 }
  0x2a   :  { %663 = shalt.err (!%p660_p4)
}
  0x2b   :  { %s664_s9 = scalar_lea.vmem %s45_s14, 2048  ;;  %p669_p6 = scmp.lt.s32.totalorder %s45_s14, %s45_s14 }
  0x2c   :  { %p665_p5 = scmp.ne.s32.totalorder %s45_s14, %s664_s9  ;;  %p670_p7 = scmp.lt.s32.totalorder %s664_s9, %s664_s9 }
  0x2e   :  { %p671_p8 = por %p670_p7, %p669_p6 }
  0x30   :  { %p672_p9 = pnand %p671_p8, %p665_p5 }
  0x32   :  { %675 = shalt.err (!%p672_p9)
}
  0x33   :  { %50 = dma.hbm_to_vmem [thread:$0]  %s881_s3, 2048, %s45_s14, [#allocation6], %s729_s7, %s729_s7, %s730_s8  }
  0x34   :  { %s733_s11 = smov [#allocation8]   ;;  %s676_s16 = scalar_lea.hbm %s883_s5, 2048 }
  0x35   :  { %s58_s12 = sshll.u32 %s733_s11, 4  ;;  %p677_p10 = scmp.ne.s32.totalorder %s883_s5, %s676_s16  ;;  %s59_s12 = int_to_ptr.vmem [resolvable:$true] %s58_s12 }
  0x36   :  { %p680_p11 = scmp.lt.u32.totalorder %s676_s16, %s883_s5 }
  0x38   :  { %p682_p12 = pnand %p680_p11, %p677_p10 }
  0x3a   :  { %685 = shalt.err (!%p682_p12)
}
  0x3b   :  { %s686_s21 = scalar_lea.vmem %s59_s12, 2048  ;;  %p691_p0 = scmp.lt.s32.totalorder %s59_s12, %s59_s12 }
  0x3c   :  { %p687_p13 = scmp.ne.s32.totalorder %s59_s12, %s686_s21  ;;  %p692_p1 = scmp.lt.s32.totalorder %s686_s21, %s686_s21 }
  0x3e   :  { %p693_p2 = por %p692_p1, %p691_p0 }
  0x40   :  { %p694_p3 = pnand %p693_p2, %p687_p13 }
  0x42   :  { %697 = shalt.err (!%p694_p3)
}
  0x43   :  { %64 = dma.hbm_to_vmem [thread:$0]  %s883_s5, 2048, %s59_s12, [#allocation9], %s729_s7, %s729_s7, %s730_s8  }
  0x44   :  { %720 = dma.done.wait [#allocation3], 128  }
  0x45   :  { %721 = vsyncadd [#allocation3], 4294967168 }
  0x46   :  { %722 = dma.done.wait [#allocation6], 4096  }
  0x47   :  { %723 = vsyncadd [#allocation6], 4294963200 }
  0x48   :  { %724 = dma.done.wait [#allocation9], 2048  }
  0x49   :  { %725 = vsyncadd [#allocation9], 4294965248  ;;  %v734_v0 = vmov 0.0|0.0   ;;  %vm735_vm0 = vmmov 0   ;;  %v736_v1 = vmov 0.0   ;;  %v78_v2 = vld [vmem:[#allocation5] sm:$0xff] }
  0x4a   :  { %528 = vmatprep.subr.bf16.mxu0 %v734_v0  ;;  %455 = vmatprep.mubr.msk.f32.mxu0 %vm735_vm0, %v736_v1  ;;  %v79_v3 = vld [vmem:[#allocation5 + $0x8] sm:$0xff]  ;;  %v80_v4 = vld [vmem:[#allocation5 + $0x10] sm:$0xff]  ;;  %v81_v6 = vld [vmem:[#allocation5 + $0x18] sm:$0xff]  ;;  %s737_s22 = smov [#allocation10]  }
  0x4b   :  { %552 = vmatprep.subr.bf16.mxu1 %v734_v0  ;;  %490 = vmatprep.mubr.msk.f32.mxu1 %vm735_vm0, %v736_v1  ;;  %v529_v5 = vpack.c.bf16 %v79_v3, %v78_v2  ;;  %v532_v7 = vpack.c.bf16 %v81_v6, %v80_v4  ;;  %v82_v8 = vld [vmem:[#allocation5 + $0x20] sm:$0xff]  ;;  %v83_v9 = vld [vmem:[#allocation5 + $0x28] sm:$0xff]  ;;  %v174_v12 = vld [vmem:[#allocation7 + $0x10] sm:$0xff] }
  0x4c   :  { %v172_v10 = vld [vmem:[#allocation7] sm:$0xff]  ;;  %v173_v11 = vld [vmem:[#allocation7 + $0x8] sm:$0xff]  ;;  %v175_v13 = vld [vmem:[#allocation7 + $0x18] sm:$0xff]  ;;  %v535_v14 = vpack.c.bf16 %v83_v9, %v82_v8 }
  0x4d   :  { %530 = vmatpush3.bf16.msra.mxu0 %v529_v5  ;;  %v553_v15 = vpack.c.bf16 %v173_v11, %v172_v10  ;;  %v84_v16 = vld [vmem:[#allocation5 + $0x30] sm:$0xff]  ;;  %v85_v17 = vld [vmem:[#allocation5 + $0x38] sm:$0xff]  ;;  %v556_v18 = vpack.c.bf16 %v175_v13, %v174_v12  ;;  %v176_v19 = vld [vmem:[#allocation7 + $0x20] sm:$0xff] }
  0x4e   :  { %531 = vmatprep.subr.bf16.mxu0 %v734_v0  ;;  %v177_v20 = vld [vmem:[#allocation7 + $0x28] sm:$0xff]  ;;  %v538_v21 = vpack.c.bf16 %v85_v17, %v84_v16  ;;  %v86_v22 = vld [vmem:[#allocation5 + $0x40] sm:$0xff]  ;;  %v178_v25 = vld [vmem:[#allocation7 + $0x30] sm:$0xff] }
  0x4f   :  { %554 = vmatpush3.bf16.msra.mxu1 %v553_v15  ;;  %v87_v23 = vld [vmem:[#allocation5 + $0x48] sm:$0xff]  ;;  %v559_v24 = vpack.c.bf16 %v177_v20, %v176_v19  ;;  %v179_v26 = vld [vmem:[#allocation7 + $0x38] sm:$0xff]  ;;  %v88_v28 = vld [vmem:[#allocation5 + $0x50] sm:$0xff] }
  0x50   :  { %555 = vmatprep.subr.bf16.mxu1 %v734_v0  ;;  %v541_v27 = vpack.c.bf16 %v87_v23, %v86_v22  ;;  %v89_v29 = vld [vmem:[#allocation5 + $0x58] sm:$0xff]  ;;  %v562_v30 = vpack.c.bf16 %v179_v26, %v178_v25  ;;  %v180_v31 = vld [vmem:[#allocation7 + $0x40] sm:$0xff]  ;;  %v181_v32 = vld [vmem:[#allocation7 + $0x48] sm:$0xff] }
  0x51   :  { %533 = vmatpush3.bf16.msra.mxu0 %v532_v7  ;;  %v544_v33 = vpack.c.bf16 %v89_v29, %v88_v28  ;;  %v90_v34 = vld [vmem:[#allocation5 + $0x60] sm:$0xff]  ;;  %v91_v35 = vld [vmem:[#allocation5 + $0x68] sm:$0xff]  ;;  %v565_v36 = vpack.c.bf16 %v181_v32, %v180_v31  ;;  %v182_v37 = vld [vmem:[#allocation7 + $0x50] sm:$0xff] }
  0x52   :  { %534 = vmatprep.subr.bf16.mxu0 %v734_v0  ;;  %v183_v38 = vld [vmem:[#allocation7 + $0x58] sm:$0xff]  ;;  %v547_v39 = vpack.c.bf16 %v91_v35, %v90_v34  ;;  %v92_v40 = vld [vmem:[#allocation5 + $0x70] sm:$0xff]  ;;  %v184_v43 = vld [vmem:[#allocation7 + $0x60] sm:$0xff] }
  0x53   :  { %557 = vmatpush3.bf16.msra.mxu1 %v556_v18  ;;  %v93_v41 = vld [vmem:[#allocation5 + $0x78] sm:$0xff]  ;;  %v568_v42 = vpack.c.bf16 %v183_v38, %v182_v37  ;;  %v185_v44 = vld [vmem:[#allocation7 + $0x68] sm:$0xff]  ;;  %v186_v48 = vld [vmem:[#allocation7 + $0x70] sm:$0xff] }
  0x54   :  { %558 = vmatprep.subr.bf16.mxu1 %v734_v0  ;;  %v550_v45 = vpack.c.bf16 %v93_v41, %v92_v40  ;;  %v571_v46 = vpack.c.bf16 %v185_v44, %v184_v43  ;;  %v77_v47 = vld [vmem:[#allocation2] sm:$0xff]  ;;  %v266_v51 = vld [vmem:[#allocation8] sm:$0xff]  ;;  %v267_v52 = vld [vmem:[#allocation8 + $0x8] sm:$0xff] }
  0x55   :  { %536 = vmatpush3.bf16.msra.mxu0 %v535_v14  ;;  %v187_v49 = vld [vmem:[#allocation7 + $0x78] sm:$0xff]  ;;  %v268_v53 = vld [vmem:[#allocation8 + $0x10] sm:$0xff]  ;;  %v577_v54 = vpack.c.bf16 %v267_v52, %v266_v51  ;;  %v270_v57 = vld [vmem:[#allocation8 + $0x20] sm:$0xff] }
  0x56   :  { %537 = vmatprep.subr.bf16.mxu0 %v734_v0  ;;  %v574_v50 = vpack.c.bf16 %v187_v49, %v186_v48  ;;  %v269_v55 = vld [vmem:[#allocation8 + $0x18] sm:$0xff]  ;;  %v271_v58 = vld [vmem:[#allocation8 + $0x28] sm:$0xff]  ;;  %v272_v60 = vld [vmem:[#allocation8 + $0x30] sm:$0xff] }
  0x57   :  { %560 = vmatpush3.bf16.msra.mxu1 %v559_v24  ;;  %v580_v56 = vpack.c.bf16 %v269_v55, %v268_v53  ;;  %v583_v59 = vpack.c.bf16 %v271_v58, %v270_v57  ;;  %v273_v61 = vld [vmem:[#allocation8 + $0x38] sm:$0xff]  ;;  %v274_v63 = vld [vmem:[#allocation8 + $0x40] sm:$0xff]  ;;  %v276_v3 = vld [vmem:[#allocation8 + $0x50] sm:$0xff] }
  0x58   :  { %561 = vmatprep.subr.bf16.mxu1 %v734_v0  ;;  %v586_v62 = vpack.c.bf16 %v273_v61, %v272_v60  ;;  %v277_v4 = vld [vmem:[#allocation8 + $0x58] sm:$0xff]  ;;  %v278_v6 = vld [vmem:[#allocation8 + $0x60] sm:$0xff]  ;;  %v279_v7 = vld [vmem:[#allocation8 + $0x68] sm:$0xff] }
  0x59   :  { %539 = vmatpush3.bf16.msra.mxu0 %v538_v21  ;;  %v592_v5 = vpack.c.bf16 %v277_v4, %v276_v3  ;;  %v595_v8 = vpack.c.bf16 %v279_v7, %v278_v6  ;;  %v370_v9 = vld [vmem:[%s880_s2] ss:$0 sm:$0xff]  ;;  %v280_v14 = vld [vmem:[#allocation8 + $0x70] sm:$0xff]  ;;  %s359_s2 = sshll.u32 %s737_s22, 4  ;;  %s360_s2 = int_to_ptr.vmem [resolvable:$true] %s359_s2 }
  0x5a   :  { %540 = vmatprep.subr.bf16.mxu0 %v734_v0  ;;  %v281_v15 = vld [vmem:[#allocation8 + $0x78] sm:$0xff]  ;;  %s698_s23 = scalar_lea.vmem %s360_s2, 128  ;;  %p703_p5 = scmp.lt.s32.totalorder %s360_s2, %s360_s2 }
  0x5b   :  { %563 = vmatpush3.bf16.msra.mxu1 %v562_v30  ;;  %v598_v16 = vpack.c.bf16 %v281_v15, %v280_v14  ;;  %v371_v17 = vld [vmem:[%s882_s4] ss:$0 sm:$0xff]  ;;  %p699_p4 = scmp.ne.s32.totalorder %s360_s2, %s698_s23  ;;  %p704_p6 = scmp.lt.s32.totalorder %s698_s23, %s698_s23 }
  0x5c   :  { %564 = vmatprep.subr.bf16.mxu1 %v734_v0 }
  0x5d   :  { %542 = vmatpush3.bf16.msra.mxu0 %v541_v27  ;;  %p705_p7 = por %p704_p6, %p703_p5 }
  0x5e   :  { %543 = vmatprep.subr.bf16.mxu0 %v734_v0 }
  0x5f   :  { %566 = vmatpush3.bf16.msra.mxu1 %v565_v36  ;;  %p706_p8 = pnand %p705_p7, %p699_p4 }
  0x60   :  { %567 = vmatprep.subr.bf16.mxu1 %v734_v0 }
  0x61   :  { %545 = vmatpush3.bf16.msra.mxu0 %v544_v33 }
  0x62   :  { %546 = vmatprep.subr.bf16.mxu0 %v734_v0 }
  0x63   :  { %569 = vmatpush3.bf16.msra.mxu1 %v568_v42 }
  0x64   :  { %570 = vmatprep.subr.bf16.mxu1 %v734_v0 }
  0x65   :  { %548 = vmatpush3.bf16.msra.mxu0 %v547_v39 }
  0x66   :  { %549 = vmatprep.subr.bf16.mxu0 %v734_v0 }
  0x67   :  { %572 = vmatpush3.bf16.msra.mxu1 %v571_v46 }
  0x68   :  { %573 = vmatprep.subr.bf16.mxu1 %v734_v0 }
  0x69   :  { %551 = vmatpush3.bf16.msra.mxu0 %v550_v45 }
  0x6a   :  { %576 = vmatprep.subr.bf16.mxu0 %v734_v0 }
  0x6b   :  { %575 = vmatpush3.bf16.msra.mxu1 %v574_v50 }
  0x6c   :  { %456 = vmatmul.mubr.f32.vlgmr.msra.gmra.mrb[0].mxu0 %v77_v47 }
  0x6d   :  { %525 = vmatprep.mubr.msk.f32.mxu0 %vm735_vm0, %v736_v1  ;;  %578 = vmatpush3.bf16.msra.mxu0 %v577_v54  ;;  %v275_v1 = vld [vmem:[#allocation8 + $0x48] sm:$0xff] }
  0x6e   :  { %579 = vmatprep.subr.bf16.mxu0 %v734_v0  ;;  %v589_v2 = vpack.c.bf16 %v275_v1, %v274_v63 }
  0x71   :  { %581 = vmatpush3.bf16.msra.mxu0 %v580_v56 }
  0x72   :  { %582 = vmatprep.subr.bf16.mxu0 %v734_v0 }
  0x75   :  { %584 = vmatpush3.bf16.msra.mxu0 %v583_v59 }
  0x76   :  { %585 = vmatprep.subr.bf16.mxu0 %v734_v0 }
  0x79   :  { %587 = vmatpush3.bf16.msra.mxu0 %v586_v62 }
  0x7a   :  { %588 = vmatprep.subr.bf16.mxu0 %v734_v0 }
  0x7d   :  { %590 = vmatpush3.bf16.msra.mxu0 %v589_v2 }
  0x7e   :  { %591 = vmatprep.subr.bf16.mxu0 %v734_v0 }
  0x81   :  { %593 = vmatpush3.bf16.msra.mxu0 %v592_v5 }
  0x82   :  { %594 = vmatprep.subr.bf16.mxu0 %v734_v0 }
  0x85   :  { %596 = vmatpush3.bf16.msra.mxu0 %v595_v8 }
  0x86   :  { %597 = vmatprep.subr.bf16.mxu0 %v734_v0 }
  0x89   :  { %599 = vmatpush3.bf16.msra.mxu0 %v598_v16 }
 0x13f   :  { %v167_v10 = vpop.f32.mrb[0].mxu0 }
 0x140   :  { %v168_v11 = vadd.f32 %v370_v9, %v167_v10  ;;  %v457_v12 = vpop.f32.mrb[1].mxu0 }
 0x142   :  { %v171_v13 = vmax.f32 %v168_v11, 0.0 }
 0x144   :  { %491 = vmatmul.mubr.f32.vlgmr.msra.gmra.mrb[0].mxu1 %v171_v13 }
 0x217   :  { %v261_v18 = vpop.f32.mrb[0].mxu1 }
 0x218   :  { %v262_v19 = vadd.f32 %v371_v17, %v261_v18  ;;  %v492_v0 = vpop.f32.mrb[1].mxu1 }
 0x21a   :  { %v265_v20 = vmax.f32 %v262_v19, 0.0 }
 0x21c   :  { %526 = vmatmul.mubr.f32.vlgmr.msra.gmra.mrb[2].mxu0 %v265_v20 }
 0x2ef   :  { %v348_v21 = vpop.f32.mrb[2].mxu0 }
 0x2f0   :  { %352 = vst [vmem:[#allocation10] sm:$0xff] %v348_v21  ;;  %v527_v22 = vpop.f32.mrb[3].mxu0 }
 0x2f1   :  { %709 = shalt.err (!%p706_p8)
}
 0x2f2   :  { %s710_s25 = scalar_lea.hbm %s884_s6, 128 }
 0x2f3   :  { %p711_p9 = scmp.ne.s32.totalorder %s884_s6, %s710_s25  ;;  %p714_p10 = scmp.lt.u32.totalorder %s710_s25, %s884_s6 }
 0x2f5   :  { %p716_p11 = pnand %p714_p10, %p711_p9 }
 0x2f7   :  { %719 = shalt.err (!%p716_p11)
}
 0x2f8   :  { %362 = dma.vmem_to_hbm [thread:$0]  %s360_s2, 128, %s884_s6, [#allocation4]  }
 0x2f9   :  { %726 = dma.done.wait [#allocation4], 128  }
 0x2fa   :  { %727 = vsyncadd [#allocation4], 4294967168 }
 0x2fb   :  { %366 = vsyncpa [#allocation3], 1 }
 0x2fc   :  { %367 = vsyncpa [#allocation6], 1 }
 0x2fd   :  { %368 = vsyncpa [#allocation9], 1 }
 0x2fe   :  { %369 = vsyncpa [#allocation4], 1 }

</bundles_post_ra>
